<compile_context>
chip_gen: v5e
topology: v5e:2x2
jax: 0.10.0
libtpu: 0.0.40
codegen_flags: <defaults>
</compile_context>

<pallas_src>
import math

import jax
import jax.numpy as jnp
import numpy as np
from jax.experimental import pallas as pl
from jax.experimental.pallas import tpu as pltpu


def _round_up(x, m):
    return ((x + m - 1) // m) * m


# ----------------------------- kernel -----------------------------

def _ffn_kernel(x_ref, w1_ref, b1_ref, w2_ref, b2_ref, out_ref, acc_ref):
    # grid = (row_tiles, hidden_tiles); hidden axis is the reduction ("arbitrary").
    k = pl.program_id(1)

    @pl.when(k == 0)
    def _init():
        acc_ref[...] = jnp.zeros_like(acc_ref)

    # First matmul: (tm, C) x (C, th) on the MXU, bf16 inputs, f32 accumulation.
    x_bf16 = x_ref[...].astype(jnp.bfloat16)
    h = jnp.dot(x_bf16, w1_ref[...], preferred_element_type=jnp.float32)
    h = jnp.maximum(h + b1_ref[...], 0.0)  # bias + ReLU in f32 (VPU)

    # Second matmul: (tm, th) x (th, C), accumulate the partial product.
    acc_ref[...] += jnp.dot(h.astype(jnp.bfloat16), w2_ref[...],
                            preferred_element_type=jnp.float32)

    @pl.when(k == pl.num_programs(1) - 1)
    def _finalize():
        out_ref[...] = (acc_ref[...] + b2_ref[...]).astype(out_ref.dtype)


# ----------------------------- wrapper -----------------------------

def feed_forward(x, w1, b1, w2, b2, *, block_m=256, block_h=512):
    """x: (..., C) f32.  w1: (C, 4C), b1: (4C,), w2: (4C, C), b2: (C,).

    Computes relu(x @ w1 + b1) @ w2 + b2 (Dropout = identity, eval semantics).
    """
    orig_shape = x.shape
    C = orig_shape[-1]
    H = w1.shape[1]
    M = math.prod(orig_shape[:-1])
    x2 = x.reshape(M, C).astype(jnp.float32)

    # Lane-dense padding: last dims -> multiples of 128, rows -> multiples of 8.
    C_pad = _round_up(C, 128)
    tm = min(block_m, _round_up(M, 8))
    M_pad = _round_up(M, tm)
    th = min(block_h, _round_up(H, 128))
    H_pad = _round_up(H, th)

    x_p = jnp.pad(x2, ((0, M_pad - M), (0, C_pad - C)))
    w1_p = jnp.pad(w1, ((0, C_pad - C), (0, H_pad - H))).astype(jnp.bfloat16)
    b1_p = jnp.pad(b1.reshape(1, H), ((0, 0), (0, H_pad - H))).astype(jnp.float32)
    w2_p = jnp.pad(w2, ((0, H_pad - H), (0, C_pad - C))).astype(jnp.bfloat16)
    b2_p = jnp.pad(b2.reshape(1, C), ((0, 0), (0, C_pad - C))).astype(jnp.float32)

    grid = (M_pad // tm, H_pad // th)

    out = pl.pallas_call(
        _ffn_kernel,
        out_shape=jax.ShapeDtypeStruct((M_pad, C_pad), jnp.float32),
        grid_spec=pltpu.PrefetchScalarGridSpec(
            num_scalar_prefetch=0,
            grid=grid,
            in_specs=[
                pl.BlockSpec((tm, C_pad), lambda i, k: (i, 0)),   # x rows (resident over k)
                pl.BlockSpec((C_pad, th), lambda i, k: (0, k)),   # W1 hidden tile
                pl.BlockSpec((1, th),     lambda i, k: (0, k)),   # b1 hidden tile
                pl.BlockSpec((th, C_pad), lambda i, k: (k, 0)),   # W2 hidden tile
                pl.BlockSpec((1, C_pad),  lambda i, k: (0, 0)),   # b2 (full)
            ],
            out_specs=pl.BlockSpec((tm, C_pad), lambda i, k: (i, 0)),
            scratch_shapes=[pltpu.VMEM((tm, C_pad), jnp.float32)],
        ),
        compiler_params=pltpu.CompilerParams(
            dimension_semantics=("parallel", "arbitrary")),
    )(x_p, w1_p, b1_p, w2_p, b2_p)

    return out[:M, :C].reshape(orig_shape)


# ----------------------------- parameter init -----------------------------

def init_params(key, n_embd):
    k1, k2 = jax.random.split(key)
    std = 0.02
    w1 = (std * jax.random.normal(k1, (n_embd, 4 * n_embd))).astype(jnp.float32)
    b1 = jnp.zeros((4 * n_embd,), jnp.float32)
    w2 = (std * jax.random.normal(k2, (4 * n_embd, n_embd))).astype(jnp.float32)
    b2 = jnp.zeros((n_embd,), jnp.float32)
    return w1, b1, w2, b2


# ----------------------------- main -----------------------------

if __name__ == "__main__":
    # Small shapes, but chosen so the kernel exercises a real (2, 2) grid:
    # rows tiled (tm=8 over 16 rows) and the hidden reduction tiled (th=128 over 256).
    B, T, n_embd = 2, 8, 64

    key = jax.random.PRNGKey(0)
    pkey, xkey = jax.random.split(key)
    w1, b1, w2, b2 = init_params(pkey, n_embd)
    x = jax.random.normal(xkey, (B, T, n_embd), dtype=jnp.float32)

    out = feed_forward(x, w1, b1, w2, b2, block_m=8, block_h=128)
    out = jax.block_until_ready(out)

    # Pure-JAX f32 reference (loose tol: kernel uses bf16 matmul inputs / f32 accum).
    ref = jnp.maximum(x @ w1 + b1, 0.0) @ w2 + b2

    assert out.shape == (B, T, n_embd), out.shape
    assert bool(jnp.all(jnp.isfinite(out)))
    assert np.allclose(np.asarray(out), np.asarray(ref), atol=1e-2, rtol=0.0), (
        float(jnp.max(jnp.abs(out - ref))))
    print("KERNEL_OK")
</pallas_src>

<mosaic_0001>
module attributes {stable_mosaic.version = 11 : i64} {
  func.func @_ffn_kernel(%arg0: i32, %arg1: i32, %arg2: memref<8x128xf32, #tpu.memory_space<vmem>>, %arg3: memref<128x128xbf16, #tpu.memory_space<vmem>>, %arg4: memref<1x128xf32, #tpu.memory_space<vmem>>, %arg5: memref<128x128xbf16, #tpu.memory_space<vmem>>, %arg6: memref<1x128xf32, #tpu.memory_space<vmem>>, %arg7: memref<8x128xf32, #tpu.memory_space<vmem>>, %arg8: memref<8x128xf32, #tpu.memory_space<vmem>>) attributes {dimension_semantics = [#tpu.dimension_semantics<parallel>, #tpu.dimension_semantics<arbitrary>], iteration_bounds = array<i64: 2, 2>, scalar_prefetch = 0 : i64, scratch_operands = 1 : i64, tpu.core_type = #tpu.core_type<tc>, window_params = [{transform_indices = @transform_0, window_bounds = array<i64: 8, 128>}, {transform_indices = @transform_1, window_bounds = array<i64: 128, 128>}, {transform_indices = @transform_2, window_bounds = array<i64: 1, 128>}, {transform_indices = @transform_3, window_bounds = array<i64: 128, 128>}, {pipeline_mode = #tpu.pipeline_mode<synchronous>, transform_indices = @transform_4, window_bounds = array<i64: 1, 128>}, {transform_indices = @transform_5, window_bounds = array<i64: 8, 128>}]} {
    %c0_i32 = arith.constant 0 : i32
    %0 = arith.cmpi eq, %arg1, %c0_i32 : i32
    %1 = arith.extui %0 : i1 to i32
    %c0_i32_0 = arith.constant 0 : i32
    %2 = arith.cmpi ne, %1, %c0_i32_0 : i32
    scf.if %2 {
      %cst_15 = arith.constant 0.000000e+00 : f32
      %21 = vector.broadcast %cst_15 : f32 to vector<8x128xf32>
      %c0_16 = arith.constant 0 : index
      %c0_17 = arith.constant 0 : index
      %22 = vector.load %arg8[%c0_16, %c0_17] : memref<8x128xf32, #tpu.memory_space<vmem>>, vector<8x128xf32>
      tpu.vector_store %arg8[%c0_16, %c0_17], %21 {strides = array<i32>} : memref<8x128xf32, #tpu.memory_space<vmem>>, vector<8x128xf32>,
    } else {
    }
    %c0 = arith.constant 0 : index
    %c0_1 = arith.constant 0 : index
    %3 = vector.load %arg2[%c0, %c0_1] : memref<8x128xf32, #tpu.memory_space<vmem>>, vector<8x128xf32>
    %4 = arith.truncf %3 : vector<8x128xf32> to vector<8x128xbf16>
    %c0_2 = arith.constant 0 : index
    %c0_3 = arith.constant 0 : index
    %5 = vector.load %arg3[%c0_2, %c0_3] : memref<128x128xbf16, #tpu.memory_space<vmem>>, vector<128x128xbf16>
    %cst = arith.constant dense<0.000000e+00> : vector<8x128xf32>
    %6 = tpu.matmul %4, %5, %cst {dimension_numbers = #tpu.dot_dimension_numbers<[1], [0], [0], [1], [0, 0, 1, 1], [], []>} : vector<8x128xbf16>, vector<128x128xbf16>, vector<8x128xf32> -> vector<8x128xf32>
    %c0_4 = arith.constant 0 : index
    %c0_5 = arith.constant 0 : index
    %7 = vector.load %arg4[%c0_4, %c0_5] : memref<1x128xf32, #tpu.memory_space<vmem>>, vector<1x128xf32>
    %8 = vector.broadcast %7 : vector<1x128xf32> to vector<8x128xf32>
    %9 = arith.addf %6, %8 : vector<8x128xf32>
    %cst_6 = arith.constant 0.000000e+00 : f32
    %10 = vector.broadcast %cst_6 : f32 to vector<8x128xf32>
    %11 = arith.maximumf %9, %10 : vector<8x128xf32>
    %c0_7 = arith.constant 0 : index
    %c0_8 = arith.constant 0 : index
    %12 = vector.load %arg8[%c0_7, %c0_8] : memref<8x128xf32, #tpu.memory_space<vmem>>, vector<8x128xf32>
    %13 = arith.truncf %11 : vector<8x128xf32> to vector<8x128xbf16>
    %c0_9 = arith.constant 0 : index
    %c0_10 = arith.constant 0 : index
    %14 = vector.load %arg5[%c0_9, %c0_10] : memref<128x128xbf16, #tpu.memory_space<vmem>>, vector<128x128xbf16>
    %cst_11 = arith.constant dense<0.000000e+00> : vector<8x128xf32>
    %15 = tpu.matmul %13, %14, %cst_11 {dimension_numbers = #tpu.dot_dimension_numbers<[1], [0], [0], [1], [0, 0, 1, 1], [], []>} : vector<8x128xbf16>, vector<128x128xbf16>, vector<8x128xf32> -> vector<8x128xf32>
    %16 = arith.addf %12, %15 : vector<8x128xf32>
    %c0_12 = arith.constant 0 : index
    %c0_13 = arith.constant 0 : index
    %17 = vector.load %arg8[%c0_12, %c0_13] : memref<8x128xf32, #tpu.memory_space<vmem>>, vector<8x128xf32>
    tpu.vector_store %arg8[%c0_12, %c0_13], %16 {strides = array<i32>} : memref<8x128xf32, #tpu.memory_space<vmem>>, vector<8x128xf32>,
    %c1_i32 = arith.constant 1 : i32
    %18 = arith.cmpi eq, %arg1, %c1_i32 : i32
    %19 = arith.extui %18 : i1 to i32
    %c0_i32_14 = arith.constant 0 : i32
    %20 = arith.cmpi ne, %19, %c0_i32_14 : i32
    scf.if %20 {
      %c0_15 = arith.constant 0 : index
      %c0_16 = arith.constant 0 : index
      %21 = vector.load %arg8[%c0_15, %c0_16] : memref<8x128xf32, #tpu.memory_space<vmem>>, vector<8x128xf32>
      %c0_17 = arith.constant 0 : index
      %c0_18 = arith.constant 0 : index
      %22 = vector.load %arg6[%c0_17, %c0_18] : memref<1x128xf32, #tpu.memory_space<vmem>>, vector<1x128xf32>
      %23 = vector.broadcast %22 : vector<1x128xf32> to vector<8x128xf32>
      %24 = arith.addf %21, %23 : vector<8x128xf32>
      %c0_19 = arith.constant 0 : index
      %c0_20 = arith.constant 0 : index
      %25 = vector.load %arg7[%c0_19, %c0_20] : memref<8x128xf32, #tpu.memory_space<vmem>>, vector<8x128xf32>
      tpu.vector_store %arg7[%c0_19, %c0_20], %24 {strides = array<i32>} : memref<8x128xf32, #tpu.memory_space<vmem>>, vector<8x128xf32>,
    } else {
    }
    return
  }
  func.func @transform_0(%arg0: i32, %arg1: i32) -> (i32, i32) {
    %c0_i32 = arith.constant 0 : i32
    %c0_i32_0 = arith.constant 0 : i32
    return %arg0, %c0_i32 : i32, i32
  }
  func.func @transform_1(%arg0: i32, %arg1: i32) -> (i32, i32) {
    %c0_i32 = arith.constant 0 : i32
    %c0_i32_0 = arith.constant 0 : i32
    return %c0_i32, %arg1 : i32, i32
  }
  func.func @transform_2(%arg0: i32, %arg1: i32) -> (i32, i32) {
    %c0_i32 = arith.constant 0 : i32
    %c0_i32_0 = arith.constant 0 : i32
    return %c0_i32, %arg1 : i32, i32
  }
  func.func @transform_3(%arg0: i32, %arg1: i32) -> (i32, i32) {
    %c0_i32 = arith.constant 0 : i32
    %c0_i32_0 = arith.constant 0 : i32
    return %arg1, %c0_i32 : i32, i32
  }
  func.func @transform_4(%arg0: i32, %arg1: i32) -> (i32, i32) {
    %c0_i32 = arith.constant 0 : i32
    %c0_i32_0 = arith.constant 0 : i32
    %c0_i32_1 = arith.constant 0 : i32
    return %c0_i32, %c0_i32_0 : i32, i32
  }
  func.func @transform_5(%arg0: i32, %arg1: i32) -> (i32, i32) {
    %c0_i32 = arith.constant 0 : i32
    %c0_i32_0 = arith.constant 0 : i32
    return %arg0, %c0_i32 : i32, i32
  }
}

</mosaic_0001>

<bundles_post_ra>
// kernel: tpu_custom_call.1
= control target key start
LH: loop header
LB: loop body
LE: loop exit
PB: predicated region body
PF: predicated region fallthrough
CT: control target
= control target key end

     0   :  { %s1521_s0 = inlined_call_operand.hbm [shape: f32[16,128], index: 0, kind: input, shape index: {}]   ;;  %s1522_s1 = inlined_call_operand.hbm [shape: bf16[128,256], index: 1, kind: input, shape index: {}]   ;;  %s1523_s2 = inlined_call_operand.hbm [shape: f32[1,256], index: 2, kind: input, shape index: {}]   ;;  %s1524_s3 = inlined_call_operand.hbm [shape: bf16[256,128], index: 3, kind: input, shape index: {}]   ;;  %s1525_s4 = inlined_call_operand.vmem [shape: f32[1,128], index: 4, kind: input, shape index: {}]   ;;  %s1526_s5 = inlined_call_operand.hbm [shape: f32[16,128], index: 5, kind: output, shape index: {}]  }
   0x1   :  { %1539 = sst [smem:[#allocation26_spill]] %s1521_s0 }
   0x2   :  { %1540 = sst [smem:[#allocation27_spill]] %s1522_s1 }
   0x3   :  { %1541 = sst [smem:[#allocation28_spill]] %s1525_s4 }
   0x4   :  { %1542 = sst [smem:[#allocation29_spill]] %s1526_s5 }
   0x5   :  { %10 = vsyncpa [#allocation4], 0 }
   0x6   :  { %12 = vsyncpa [#allocation4 + $0x1], 0 }
   0x7   :  { %13 = vsyncpa [#allocation7], 0 }
   0x8   :  { %15 = vsyncpa [#allocation7 + $0x1], 0 }
   0x9   :  { %16 = vsyncpa [#allocation10], 0 }
   0xa   :  { %18 = vsyncpa [#allocation10 + $0x1], 0 }
   0xb   :  { %19 = vsyncpa [#allocation5], 0 }
   0xc   :  { %21 = vsyncpa [#allocation5 + $0x1], 0  ;;  %s1222_s18 = smov 0   ;;  %s1224_s19 = smov 0  }
   0xd   :  { %s1226_s20 = smov 0   ;;  %s1228_s21 = smov 0  }
   0xe   :  { %s1230_s22 = smov 0   ;;  %s1232_s23 = smov 0  }
   0xf   :  { %s1234_s24 = smov 0   ;;  %s1236_s25 = smov 0  }
  0x10   :  { %s1238_s26 = smov 0   ;;  %s1240_s27 = smov 0  }
  0x11   :  { %s1242_s28 = smov 0  }
  0x12 LB: > { %1543 = sst [smem:[#allocation16_spill]] %s1154_s20  ;;  %p54_p0 = scmp.eq.s32.totalorder %s1186_s28, 0  ;;  %s1186_s28 = sphi %s1242_s28, %s27_s28   ;;  %s1182_s27 = sphi %s1240_s27, %s1579_s27   ;;  %s1178_s26 = sphi %s1238_s26, %s1585_s26   ;;  %s1174_s25 = sphi %s1236_s25, %s1577_s25   ;;  %s1170_s24 = sphi %s1234_s24, %s1584_s24   ;;  %s1166_s23 = sphi %s1232_s23, %s1576_s23   ;;  %s1162_s22 = sphi %s1230_s22, %s1583_s22   ;;  %s1158_s21 = sphi %s1228_s21, %s1582_s21   ;;  %s1154_s20 = sphi %s1226_s20, %s1574_s20   ;;  %s1150_s19 = sphi %s1224_s19, %s1581_s19   ;;  %s1146_s18 = sphi %s1222_s18, %s1580_s18  }
  0x13   : > { %1544 = sst [smem:[#allocation17_spill]] %s1158_s21  ;;  %p79_p1 = scmp.ne.s32.totalorder %s1154_s20, %s1150_s19 }
  0x14   : > { %1545 = sst [smem:[#allocation18_spill]] %s1166_s23  ;;  %p1532_p2 = scmp.lt.s32.totalorder %s1186_s28, 4 }
  0x15   : > { %1546 = sst [smem:[#allocation19_spill]] %s1174_s25  ;;  %s230_s30 = sand.u32 1, %s1186_s28  }
  0x16   : > { %1547 = sst [smem:[#allocation20_spill]] %s1182_s27  ;;  %p81_p3 = por %p79_p1, %p54_p0 }
  0x17   : > { %s1286_s6 = sand.u32 1, %s1154_s20   ;;  %s717_s7 = sshll.u32 %s1178_s26, 2 }
  0x18   : > { %s1527_s8 = sshll.u32 %s1286_s6, 6  ;;  %s1548_s1 = sld [smem:[#allocation27_spill]] }
  0x19   : > { %s234_s13 = scalar_lea.vmem [#allocation6], %s1527_s8  ;;  %p1297_p4 = pnand %p1532_p2, %p81_p3 }
  0x1a   : > { %s241_s14 = sshll.u32 %s234_s13, 4  ;;  %s1301_s16 = scalar_lea.sflag [#allocation7], %s230_s30  ;;  %s242_s14 = int_to_ptr.vmem [resolvable:$true] %s241_s14 }
  0x1b   : > { %s1188_s17 = smov 128   ;;  %s1529_s9 = smov 4  }
  0x1c   : > { %p721_p5 = scmp.ge.s32.totalorder %s1186_s28, 1  ;;  %p288_p6 = scmp.lt.s32.totalorder %s1186_s28, 5 }
  0x1d   : > { %s1315_s10 = sadd.s32 4294967295, %s1186_s28   ;;  %s36_s13 = sadd.s32 1, %s1178_s26 }
  0x1e   : > { %s238_s11 = scalar_lea.hbm %s1548_s1, %s717_s7  ;;  %s1528_s7 = smov 64  }
  0x1f   : > { %s239_s12 = sshll.u32 %s238_s11, 4  ;;  %p1310_p7 = pnand %p721_p5, %p288_p6  ;;  %s240_s12 = int_to_ptr.hbm [resolvable:$true] %s239_s12 }
  0x20   : > { %829 = dma.hbm_to_vmem [thread:$0]  (!%p1297_p4), %s240_s12, 1024, %s242_s14, %s1301_s16, %s1188_s17, %s1528_s7, %s1529_s9  }
  0x21   : > { %s711_s11 = sadd.s32 4294967294, %s1186_s28   ;;  %p37_p8 = scmp.ge.s32.totalorder %s36_s13, 2 }
  0x22   : > { %s39_s8 = sadd.s32 1, %s1182_s27  ;;  %s46_s12 = sadd.s32 1, %s1166_s23 }
  0x23   : > { %p53_p9 = scmp.ne.s32.totalorder %s1166_s23, %s1162_s22  ;;  %s1587_s13 = smov (%p37_p8, %s36_s13), 0 }
  0x24   : > { %1551 = sst [smem:[#allocation21_spill]] %s1587_s13  ;;  %s1589_s8 = smov (!%p37_p8, %s39_s8), %s1182_s27 }
  0x25   : > { %p1331_p10 = por %p54_p0, %p53_p9  ;;  %p59_p11 = scmp.ne.s32.totalorder %s1162_s22, %s1158_s21 }
  0x26   : > { %p41_p12 = scmp.ge.s32.totalorder %s1589_s8, 2  ;;  %p60_p13 = scmp.eq.s32.totalorder %s1315_s10, 0 }
  0x27   : > { %s69_s17 = ssub.s32 %s1178_s26, %s1587_s13  ;;  %p85_p1 = scmp.ne.s32.totalorder %s1150_s19, %s1146_s18 }
  0x28   : > { %s1591_s8 = smov (%p41_p12, %s1589_s8), 0  ;;  %p1347_p3 = por %p60_p13, %p59_p11 }
  0x29   : > { %1553 = sst [smem:[#allocation22_spill]] %s1591_s8  ;;  %p70_p0 = scmp.eq.s32.totalorder %s69_s17, 0 }
  0x2a   : > { %s43_s9 = ssub.s32 %s1182_s27, %s1591_s8  ;;  %p1353_p5 = por %p85_p1, %p60_p13 }
  0x2b   : > { %p44_p6 = scmp.eq.s32.totalorder %s43_s9, 0  ;;  %p182_p8 = scmp.eq.s32.totalorder %s1315_s10, 3 }
  0x2c   : > { %s1556_s1 = sadd.s32 1, %s1154_s20  ;;  %p188_p2 = scmp.eq.s32.totalorder %s711_s11, 3 }
  0x2d   : > { %s1361_s18 = scalar_select %p70_p0, %s1154_s20, %s1556_s1  }
  0x2e   : > { %s1364_s13 = scalar_select %p44_p6, %s1166_s23, %s46_s12  }
  0x2f   : > { %1557 = sst [smem:[#allocation23_spill]] %s1361_s18  ;;  %p1369_p12 = por %p182_p8, %p53_p9 }
  0x30   : > { %1558 = sst [smem:[#allocation24_spill]] %s1364_s13  ;;  %s211_s17 = sand.u32 1, %s1166_s23  }
  0x31   : > { %s715_s8 = sshll.u32 %s1182_s27, 3  ;;  %p1378_p13 = por %p188_p2, %p59_p11 }
  0x32   : > { %s714_s25 = sshll.u32 %s211_s17, 3  ;;  %s1562_s0 = sld [smem:[#allocation26_spill]] }
  0x33   : > { %s1560_s9 = scalar_select %p1378_p13, 1, 0 }
  0x34   : > { %s215_s11 = scalar_lea.vmem [#allocation3], %s714_s25  ;;  %p1563_p9 = scmp.lt.s32.totalorder %s1186_s28, 4 }
  0x35   : > { %1561 = sst [smem:[#allocation25_spill]] %s1560_s9  ;;  %s223_s23 = sshll.u32 %s215_s11, 4  ;;  %s224_s23 = int_to_ptr.vmem [resolvable:$true] %s223_s23 }
  0x36   : > { %p824_p2 = pnand %p1563_p9, %p1331_p10  ;;  %s257_s20 = scalar_lea.hbm %s1523_s2, %s1178_s26 }
  0x37   : > { %s259_s9 = sshll.u32 %s257_s20, 4  ;;  %s212_s4 = scalar_lea.sflag [#allocation4], %s211_s17  ;;  %s260_s9 = int_to_ptr.hbm [resolvable:$true] %s259_s9 }
  0x38   : > { %s219_s12 = scalar_lea.hbm %s1562_s0, %s715_s8  ;;  %s254_s8 = scalar_lea.vmem [#allocation8], %s1286_s6 }
  0x39   : > { %s221_s13 = sshll.u32 %s219_s12, 4  ;;  %s261_s1 = sshll.u32 %s254_s8, 4  ;;  %s222_s13 = int_to_ptr.hbm [resolvable:$true] %s221_s13  ;;  %s262_s1 = int_to_ptr.vmem [resolvable:$true] %s261_s1 }
  0x3a   : > { %826 = dma.hbm_to_vmem [thread:$0]  (!%p824_p2), %s222_s13, 128, %s224_s23, %s212_s4  }
  0x3b   : > { %832 = dma.hbm_to_vmem [thread:$0]  (!%p1297_p4), %s260_s9, 16, %s262_s1, %s1301_s16  }
  0x3c   : > { %s796_s25 = sshll.u32 %s1178_s26, 6  ;;  %s1564_s0 = sshll.u32 %s1286_s6, 6 }
  0x3d   : > { %s277_s11 = scalar_lea.hbm %s1524_s3, %s796_s25  ;;  %s272_s21 = scalar_lea.vmem [#allocation9], %s1564_s0 }
  0x3e   : > { %s280_s27 = sshll.u32 %s272_s21, 4  ;;  %s278_s18 = sshll.u32 %s277_s11, 4  ;;  %s281_s27 = int_to_ptr.vmem [resolvable:$true] %s280_s27  ;;  %s279_s18 = int_to_ptr.hbm [resolvable:$true] %s278_s18 }
  0x3f   : > { %s269_s20 = scalar_lea.sflag [#allocation10], %s1286_s6  ;;  %s1565_s23 = smov 4  }
  0x40   : > { %s1566_s13 = smov 64   ;;  %292 = sbr.rel (%p1310_p7) target bundleno = 410 (0x19a), region = 40 }
  0x41   : > { %835 = dma.hbm_to_vmem [thread:$0]  (!%p1297_p4), %s279_s18, 1024, %s281_s27, %s269_s20, %s1566_s13, %s1566_s13, %s1565_s23  }
  0x42   : > { %s1412_s16 = sand.u32 (!%p1310_p7), 1, %s1162_s22  }
  0x43   : > { %s722_s0 = sshll.u32 (!%p1310_p7), %s1412_s16, 3  ;;  %s295_s21 = scalar_lea.sflag (!%p1310_p7), [#allocation4], %s1412_s16 }
  0x44   : > { %s1416_s17 = scalar_lea.vmem (!%p1310_p7), [#allocation3], %s722_s0 }
  0x45   : > { %1129 = dma.done.wait (%p1347_p3), %s295_s21, 128  }
  0x46   : > { %1131 = vsyncadd (%p1347_p3), %s295_s21, 4294967168  ;;  %s304_s6 = sand.u32 1, %s1315_s10   ;;  %s1424_s15 = sand.u32 1, %s1150_s19  }
  0x47   : > { %s723_s30 = sshll.u32 %s1424_s15, 6  ;;  %s305_s9 = scalar_lea.sflag [#allocation7], %s304_s6 }
  0x48   : > { %s1427_s4 = scalar_lea.vmem [#allocation6], %s723_s30 }
  0x49   : > { %1133 = dma.done.wait (%p1353_p5), %s305_s9, 1040  }
  0x4a   : > { %1135 = vsyncadd (%p1353_p5), %s305_s9, 4294966256  ;;  %s317_s7 = scalar_lea.vmem [#allocation8], %s1424_s15  ;;  %s324_s8 = scalar_lea.sflag [#allocation10], %s1424_s15 }
  0x4b   : > { %s1435_s1 = scalar_lea.vmem [#allocation9], %s723_s30 }
  0x4c   : > { %1137 = dma.done.wait (%p1353_p5), %s324_s8, 1024  }
  0x4d   : > { %1139 = vsyncadd (%p1353_p5), %s324_s8, 4294966272  ;;  %s1441_s10 = scalar_lea.vmem [#allocation11], %s722_s0  ;;  %p726_p4 = scmp.ne.s32.totalorder %s1170_s24, 0 }
  0x4f   : > { %373 = sbr.rel (%p726_p4) target bundleno = 86 (0x56), region = 60 }
  0x54   : > { %v1191_v0 = vmov 0.0  }
  0x55   : > { %374 = vst [vmem:[#allocation2] sm:$0xff] %v1191_v0 }
  0x56 PF: > { %v804_v1 = vld [vmem:[%s1427_s4 + $0x38] sm:$0xff]  ;;  %v803_v2 = vld [vmem:[%s1427_s4 + $0x30] sm:$0xff]  ;;  %v802_v5 = vld [vmem:[%s1427_s4 + $0x28] sm:$0xff]  ;;  %p791_p7 = scmp.ne.s32.totalorder %s1170_s24, 1 }
  0x57   : > { %445 = vmatpush.bf16.msra.mxu0 %v804_v1  ;;  %v812_v3 = vld [vmem:[%s1435_s1 + $0x38] sm:$0xff]  ;;  %v811_v4 = vld [vmem:[%s1435_s1 + $0x30] sm:$0xff]  ;;  %v810_v6 = vld [vmem:[%s1435_s1 + $0x28] sm:$0xff]  ;;  %s1567_s12 = sld [smem:[#allocation28_spill]] (!%p791_p7) }
  0x58   : > { %525 = vmatpush.bf16.msra.mxu1 %v812_v3  ;;  %v801_v7 = vld [vmem:[%s1427_s4 + $0x20] sm:$0xff]  ;;  %v800_v9 = vld [vmem:[%s1427_s4 + $0x18] sm:$0xff]  ;;  %v799_v11 = vld [vmem:[%s1427_s4 + $0x10] sm:$0xff] }
  0x59   : > { %v809_v8 = vld [vmem:[%s1435_s1 + $0x20] sm:$0xff]  ;;  %v808_v10 = vld [vmem:[%s1435_s1 + $0x18] sm:$0xff]  ;;  %v807_v12 = vld [vmem:[%s1435_s1 + $0x10] sm:$0xff] }
  0x5a   : > { %v798_v13 = vld [vmem:[%s1427_s4 + $0x8] sm:$0xff]  ;;  %v797_v14 = vld [vmem:[%s1427_s4] sm:$0xff]  ;;  %v375_v15 = vld [vmem:[%s1416_s17] sm:$0xff] }
  0x5b   : > { %446 = vmatpush.bf16.msra.mxu0 %v803_v2  ;;  %v376_v16 = vpack.c.bf16 %v375_v15, %v375_v15  ;;  %v806_v17 = vld [vmem:[%s1435_s1 + $0x8] sm:$0xff]  ;;  %v805_v18 = vld [vmem:[%s1435_s1] sm:$0xff] }
  0x5c   : > { %526 = vmatpush.bf16.msra.mxu1 %v811_v4  ;;  %v934_v19 = vld [vmem:[%s317_s7] ss:$0 sm:$0xff] }
  0x5d   : > { %v459_v25 = vld [vmem:[#allocation2] sm:$0xff] }
  0x5f   : > { %447 = vmatpush.bf16.msra.mxu0 %v802_v5 }
  0x60   : > { %527 = vmatpush.bf16.msra.mxu1 %v810_v6 }
  0x63   : > { %448 = vmatpush.bf16.msra.mxu0 %v801_v7 }
  0x64   : > { %528 = vmatpush.bf16.msra.mxu1 %v809_v8 }
  0x67   : > { %449 = vmatpush.bf16.msra.mxu0 %v800_v9 }
  0x68   : > { %529 = vmatpush.bf16.msra.mxu1 %v808_v10 }
  0x6b   : > { %450 = vmatpush.bf16.msra.mxu0 %v799_v11 }
  0x6c   : > { %530 = vmatpush.bf16.msra.mxu1 %v807_v12 }
  0x6f   : > { %451 = vmatpush.bf16.msra.mxu0 %v798_v13 }
  0x70   : > { %531 = vmatpush.bf16.msra.mxu1 %v806_v17 }
  0x73   : > { %452 = vmatpush.bf16.msra.mxu0 %v797_v14 }
  0x74   : > { %532 = vmatpush.bf16.msra.mxu1 %v805_v18 }
  0x76   : > { %453 = vmatmul.bf16.vlgmr.msra.gmra.mxu0 %v376_v16 }
  0xf3   : > { %v454_v20 = vpop.f32.mrf.mxu0 }
  0xf4   : > { %v455_v21 = vadd.f32 %v934_v19, %v454_v20 }
  0xf6   : > { %v458_v22 = vmax.f32 %v455_v21, 0.0 }
  0xf8   : > { %v460_v23 = vpack.c.bf16 %v458_v22, %v458_v22 }
  0xfa   : > { %533 = vmatmul.bf16.vlgmr.msra.gmra.mxu1 %v460_v23 }
  0xfb   : > { %v456_v24 = vpop.f32.mrf.mxu0 }
 0x177   : > { %v534_v26 = vpop.f32.mrf.mxu1 }
 0x178   : > { %v538_v27 = vadd.f32 %v534_v26, %v459_v25 }
 0x17a   : > { %539 = vst [vmem:[#allocation2] sm:$0xff] %v538_v27 }
 0x17b   : > { %543 = sbr.rel (%p791_p7) target bundleno = 389 (0x185), region = 64 }
 0x17f   : > { %v536_v28 = vpop.f32.mrf.mxu1 }
 0x180   : > { %v935_v30 = vld [vmem:[%s1567_s12] ss:$0 sm:$0xff] }
 0x181   : > { %v544_v29 = vld [vmem:[#allocation2] sm:$0xff] }
 0x182   : > { %v549_v31 = vadd.f32 %v935_v30, %v544_v29 }
 0x184   : > { %550 = vst [vmem:[%s1441_s10] sm:$0xff] %v549_v31 }
 0x185 PF: > { %s1568_s14 = sld [smem:[#allocation19_spill]]  ;;  %s564_s24 = sshll.u32 %s1441_s10, 4  ;;  %s565_s24 = int_to_ptr.vmem [resolvable:$true] %s564_s24 }
 0x186   : > { %s1569_s20 = sld [smem:[#allocation29_spill]]  ;;  %s552_s21 = scalar_lea.sflag [#allocation5], %s1412_s16 }
 0x18b   : > { %s793_s11 = sshll.u32 %s1568_s14, 3 }
 0x18c   : > { %s1570_s13 = smov %s1569_s20  ;;  %s562_s23 = scalar_lea.hbm %s1569_s20, %s793_s11 }
 0x18d   : > { %s566_s0 = sshll.u32 %s562_s23, 4  ;;  %s1076_s9 = scalar_lea.hbm %s1570_s13, 16  ;;  %s567_s0 = int_to_ptr.hbm [resolvable:$true] %s566_s0 }
 0x18e   : > { %s1070_s17 = sshra.s32 %s567_s0, 4  ;;  %s1071_s17 = int_to_ptr.hbm [resolvable:$true] %s1070_s17 }
 0x18f   : > { %s1072_s6 = scalar_lea.hbm %s1071_s17, 8  ;;  %p1077_p3 = scmp.lt.s32.totalorder %s1071_s17, %s1570_s13 }
 0x190   : > { %p1073_p10 = scmp.ne.s32.totalorder %s1071_s17, %s1072_s6  ;;  %p1078_p0 = scmp.lt.s32.totalorder %s1076_s9, %s1072_s6 }
 0x192   : > { %p1074_p11 = pnand %p1073_p10, %p1369_p12  ;;  %p1079_p5 = por %p1078_p0, %p1077_p3 }
 0x194   : > { %p1075_p1 = pneg %p1074_p11 }
 0x196   : > { %p1080_p6 = pnand %p1079_p5, %p1075_p1 }
 0x198   : > { %1083 = shalt.err (!%p1080_p6)
}
 0x199   : > { %821 = dma.vmem_to_hbm [thread:$0]  (%p1369_p12), %s565_s24, 128, %s567_s0, %s552_s21  }
 0x19a PF: > { %s1571_s16 = sld [smem:[#allocation17_spill]]  ;;  %p841_p8 = scmp.ge.s32.totalorder %s1186_s28, 2 }
 0x19c   : > { %p837_p9 = pnand %p841_p8, %p1378_p13 }
 0x19e   : > { %p838_p2 = pneg %p837_p9 }
 0x1a0   : > { %s578_s1 = sand.u32 1, %s1571_s16  }
 0x1a1   : > { %s579_s10 = scalar_lea.sflag [#allocation5], %s578_s1 }
 0x1a2   : > { %1141 = dma.done.wait (%p838_p2), %s579_s10, 128  }
 0x1a3   : > { %1143 = vsyncadd (%p838_p2), %s579_s10, 4294967168  ;;  %s27_s28 = sadd.s32 1, %s1186_s28   ;;  %s1573_s29 = sld [smem:[#allocation16_spill]] }
 0x1a4   : > { %p24_p4 = scmp.ge.s32.totalorder %s27_s28, 6   ;;  %s1574_s20 = sld [smem:[#allocation23_spill]] }
 0x1a5   : > { %s1575_s5 = sld [smem:[#allocation18_spill]]  ;;  %s1580_s18 = smov %s1150_s19 }
 0x1a6   : > { %s1576_s23 = sld [smem:[#allocation24_spill]]  ;;  %s1582_s21 = smov %s1162_s22 }
 0x1a7   : > { %s1577_s25 = sld [smem:[#allocation20_spill]]  ;;  %s1584_s24 = smov %s1178_s26 }
 0x1a8   : > { %s1578_s12 = sld [smem:[#allocation21_spill]] }
 0x1a9   : > { %s1579_s27 = sld [smem:[#allocation22_spill]]  ;;  %s1581_s19 = smov %s1573_s29 }
 0x1aa   :  { %26 = sbr.rel (!%p24_p4) target bundleno = 18 (0x12), region = 130 }
 0x1ab   : > { %s1583_s22 = smov %s1575_s5 }
 0x1ae   : > { %s1585_s26 = smov %s1578_s12 }
 0x1af   :  { %585 = vsyncpa [#allocation4], 1 }
 0x1b0   :  { %587 = vsyncpa [#allocation4 + $0x1], 1 }
 0x1b1   :  { %588 = vsyncpa [#allocation7], 1 }
 0x1b2   :  { %590 = vsyncpa [#allocation7 + $0x1], 1 }
 0x1b3   :  { %591 = vsyncpa [#allocation10], 1 }
 0x1b4   :  { %593 = vsyncpa [#allocation10 + $0x1], 1 }
 0x1b5   :  { %594 = vsyncpa [#allocation5], 1 }
 0x1b6   :  { %596 = vsyncpa [#allocation5 + $0x1], 1 }

</bundles_post_ra>
